<compile_context>
chip_gen: v7x
topology: tpu7x:2x2x1
jax: 0.10.0
libtpu: 0.0.40
codegen_flags: <defaults>
</compile_context>

<pallas_src>
import math

import jax
import jax.numpy as jnp
from jax.experimental import pallas as pl
from jax.experimental.pallas import tpu as pltpu


def _attention_kernel(q_ref, k_ref, v_ref, out_ref, attn_ref):
    # Refs (batch dim squeezed out by the BlockSpecs):
    #   q_ref: (TQ, D), k_ref: (Lk, D), v_ref: (Lk, Dv)
    #   out_ref: (TQ, Dv), attn_ref: (TQ, Lk)
    d_k = k_ref.shape[-1]
    scale = 1.0 / math.sqrt(d_k)

    # Fold the 1/sqrt(d_k) scale into q (fewer VALU ops than scaling scores).
    q = q_ref[...].astype(jnp.float32) * jnp.float32(scale)
    k = k_ref[...].astype(jnp.float32)

    # scores: (TQ, Lk) on the MXU; contract the D (lane) axis of both operands
    # directly — no explicit transpose needed.
    s = jax.lax.dot_general(
        q, k, (((1,), (1,)), ((), ())), preferred_element_type=jnp.float32
    )

    # Numerically-stable softmax over keys (row-wise; K/V are full per step,
    # so no key masking is required even when Lq is tiled).
    m = jnp.max(s, axis=-1, keepdims=True)
    p = jnp.exp(s - m)
    denom = jnp.sum(p, axis=-1, keepdims=True)
    # Exact normalization (approx reciprocal was not accurate enough for the
    # output tolerance).
    attn = p / denom

    v = v_ref[...].astype(jnp.float32)
    out = jnp.dot(attn, v, preferred_element_type=jnp.float32)

    out_ref[...] = out.astype(out_ref.dtype)
    attn_ref[...] = attn.astype(attn_ref.dtype)


def _choose_tq(Lq, Lk, D, Dv, itemsize, budget_bytes=12 << 20):
    """Pick a query-tile size whose double-buffered working set fits a budget
    that is safe on all of v5e (16 MiB scoped default), v6e and v7x."""
    kv_bytes = 2 * itemsize * Lk * (D + Dv)            # K, V (double-buffered)
    per_row = 2 * itemsize * (D + Dv + Lk) + 8 * Lk    # q/out/attn I/O + f32 temps
    avail = max(budget_bytes - kv_bytes, per_row * 8)
    tq = int(avail // per_row)
    tq = max(8, min(tq, 256, Lq))
    if tq < Lq:
        tq = max(8, (tq // 8) * 8)  # sublane-aligned block (f32: multiple of 8)
    else:
        tq = Lq                      # full dim is always a legal block
    return tq


def attention(q, k, v):
    """Pallas equivalent of Attention.forward(q, k, v) -> (output, attn)."""
    B, Lq, D = q.shape
    Bk, Lk, Dk = k.shape
    Bv, Lkv, Dv = v.shape
    assert D == Dk and Bk == B and Bv == B and Lkv == Lk

    itemsize = jnp.dtype(q.dtype).itemsize
    tq = _choose_tq(Lq, Lk, D, Dv, itemsize)
    n_q_tiles = pl.cdiv(Lq, tq)

    out_shapes = (
        jax.ShapeDtypeStruct((B, Lq, Dv), q.dtype),   # output
        jax.ShapeDtypeStruct((B, Lq, Lk), q.dtype),   # attention weights
    )

    grid_spec = pltpu.PrefetchScalarGridSpec(
        num_scalar_prefetch=0,
        grid=(B, n_q_tiles),
        in_specs=[
            # batch dim squeezed (None) -> 2-D refs in the kernel
            pl.BlockSpec((None, tq, D), lambda b, i: (b, i, 0)),
            pl.BlockSpec((None, Lk, D), lambda b, i: (b, 0, 0)),
            pl.BlockSpec((None, Lk, Dv), lambda b, i: (b, 0, 0)),
        ],
        out_specs=[
            pl.BlockSpec((None, tq, Dv), lambda b, i: (b, i, 0)),
            pl.BlockSpec((None, tq, Lk), lambda b, i: (b, i, 0)),
        ],
    )

    flops = 2 * B * Lq * Lk * (D + Dv)
    bytes_accessed = itemsize * B * (
        Lq * D + Lk * D + Lk * Dv + Lq * Dv + Lq * Lk
    )

    return pl.pallas_call(
        _attention_kernel,
        out_shape=out_shapes,
        grid_spec=grid_spec,
        compiler_params=pltpu.CompilerParams(
            # both axes independent (K/V re-fetched per tile, no accumulation)
            dimension_semantics=("parallel", "parallel"),
            vmem_limit_bytes=32 * 1024 * 1024,
        ),
        cost_estimate=pl.CostEstimate(
            flops=flops,
            transcendentals=B * Lq * Lk,       # exp
            bytes_accessed=bytes_accessed,
        ),
    )(q, k, v)


def _reference(q, k, v):
    d_k = k.shape[-1]
    s = jnp.einsum(
        "bqd,bkd->bqk", q, k, precision=jax.lax.Precision.HIGHEST
    ) / jnp.sqrt(jnp.float32(d_k))
    attn = jax.nn.softmax(s, axis=-1)
    out = jnp.einsum(
        "bqk,bkd->bqd", attn, v, precision=jax.lax.Precision.HIGHEST
    )
    return out, attn


if __name__ == "__main__":
    # Small but lane-dense shapes (last dims multiples of 128).
    B, Lq, Lk, D = 2, 128, 128, 128
    key = jax.random.PRNGKey(0)
    kq, kk, kv = jax.random.split(key, 3)
    q = jax.random.normal(kq, (B, Lq, D), dtype=jnp.float32)
    k = jax.random.normal(kk, (B, Lk, D), dtype=jnp.float32)
    v = jax.random.normal(kv, (B, Lk, D), dtype=jnp.float32)

    out, attn = attention(q, k, v)
    out = jax.block_until_ready(out)
    attn = jax.block_until_ready(attn)

    out_ref, attn_ref = _reference(q, k, v)
    assert jnp.allclose(out, out_ref, atol=2e-4, rtol=2e-4), (
        float(jnp.max(jnp.abs(out - out_ref)))
    )
    assert jnp.allclose(attn, attn_ref, atol=2e-4, rtol=2e-4), (
        float(jnp.max(jnp.abs(attn - attn_ref)))
    )

    print("KERNEL_OK")
</pallas_src>

<mosaic_0001>
module attributes {stable_mosaic.version = 11 : i64} {
  func.func @_attention_kernel(%arg0: i32, %arg1: i32, %arg2: memref<1x128x128xf32, #tpu.memory_space<vmem>>, %arg3: memref<1x128x128xf32, #tpu.memory_space<vmem>>, %arg4: memref<1x128x128xf32, #tpu.memory_space<vmem>>, %arg5: memref<1x128x128xf32, #tpu.memory_space<vmem>>, %arg6: memref<1x128x128xf32, #tpu.memory_space<vmem>>) attributes {dimension_semantics = [#tpu.dimension_semantics<parallel>, #tpu.dimension_semantics<parallel>], iteration_bounds = array<i64: 2, 1>, scalar_prefetch = 0 : i64, scratch_operands = 0 : i64, tpu.core_type = #tpu.core_type<tc>, window_params = [{transform_indices = @transform_0, window_bounds = array<i64: 1, 128, 128>}, {transform_indices = @transform_1, window_bounds = array<i64: 1, 128, 128>}, {transform_indices = @transform_2, window_bounds = array<i64: 1, 128, 128>}, {transform_indices = @transform_3, window_bounds = array<i64: 1, 128, 128>}, {transform_indices = @transform_4, window_bounds = array<i64: 1, 128, 128>}]} {
    %c0 = arith.constant 0 : index
    %c0_0 = arith.constant 0 : index
    %c0_1 = arith.constant 0 : index
    %0 = vector.load %arg2[%c0, %c0_0, %c0_1] : memref<1x128x128xf32, #tpu.memory_space<vmem>>, vector<1x128x128xf32>
    %1 = vector.shape_cast %0 : vector<1x128x128xf32> to vector<128x128xf32>
    %cst = arith.constant 0.0883883461 : f32
    %2 = vector.broadcast %cst : f32 to vector<128x128xf32>
    %3 = arith.mulf %1, %2 : vector<128x128xf32>
    %c0_2 = arith.constant 0 : index
    %c0_3 = arith.constant 0 : index
    %c0_4 = arith.constant 0 : index
    %4 = vector.load %arg3[%c0_2, %c0_3, %c0_4] : memref<1x128x128xf32, #tpu.memory_space<vmem>>, vector<1x128x128xf32>
    %5 = vector.shape_cast %4 : vector<1x128x128xf32> to vector<128x128xf32>
    %cst_5 = arith.constant dense<0.000000e+00> : vector<128x128xf32>
    %6 = tpu.matmul %3, %5, %cst_5 {dimension_numbers = #tpu.dot_dimension_numbers<[1], [1], [0], [0], [0, 0, 1, 0], [], []>} : vector<128x128xf32>, vector<128x128xf32>, vector<128x128xf32> -> vector<128x128xf32>
    %cst_6 = arith.constant dense<0xFF800000> : vector<128xf32>
    %7 = vector.multi_reduction <maximumf>, %6, %cst_6 [1] : vector<128x128xf32> to vector<128xf32>
    %8 = vector.shape_cast %7 : vector<128xf32> to vector<128x1xf32>
    %9 = vector.broadcast %8 : vector<128x1xf32> to vector<128x128xf32>
    %10 = arith.subf %6, %9 : vector<128x128xf32>
    %11 = math.exp %10 : vector<128x128xf32>
    %cst_7 = arith.constant dense<0.000000e+00> : vector<128xf32>
    %12 = vector.multi_reduction <add>, %11, %cst_7 [1] : vector<128x128xf32> to vector<128xf32>
    %13 = vector.shape_cast %12 : vector<128xf32> to vector<128x1xf32>
    %14 = vector.broadcast %13 : vector<128x1xf32> to vector<128x128xf32>
    %15 = arith.divf %11, %14 : vector<128x128xf32>
    %c0_8 = arith.constant 0 : index
    %c0_9 = arith.constant 0 : index
    %c0_10 = arith.constant 0 : index
    %16 = vector.load %arg4[%c0_8, %c0_9, %c0_10] : memref<1x128x128xf32, #tpu.memory_space<vmem>>, vector<1x128x128xf32>
    %17 = vector.shape_cast %16 : vector<1x128x128xf32> to vector<128x128xf32>
    %cst_11 = arith.constant dense<0.000000e+00> : vector<128x128xf32>
    %18 = tpu.matmul %15, %17, %cst_11 {dimension_numbers = #tpu.dot_dimension_numbers<[1], [0], [0], [1], [0, 0, 1, 1], [], []>} : vector<128x128xf32>, vector<128x128xf32>, vector<128x128xf32> -> vector<128x128xf32>
    %c0_12 = arith.constant 0 : index
    %c0_13 = arith.constant 0 : index
    %c0_14 = arith.constant 0 : index
    %19 = vector.load %arg5[%c0_12, %c0_13, %c0_14] : memref<1x128x128xf32, #tpu.memory_space<vmem>>, vector<1x128x128xf32>
    %20 = vector.shape_cast %19 : vector<1x128x128xf32> to vector<128x128xf32>
    %21 = vector.shape_cast %18 : vector<128x128xf32> to vector<1x128x128xf32>
    tpu.vector_store %arg5[%c0_12, %c0_13, %c0_14], %21 {strides = array<i32>} : memref<1x128x128xf32, #tpu.memory_space<vmem>>, vector<1x128x128xf32>,
    %c0_15 = arith.constant 0 : index
    %c0_16 = arith.constant 0 : index
    %c0_17 = arith.constant 0 : index
    %22 = vector.load %arg6[%c0_15, %c0_16, %c0_17] : memref<1x128x128xf32, #tpu.memory_space<vmem>>, vector<1x128x128xf32>
    %23 = vector.shape_cast %22 : vector<1x128x128xf32> to vector<128x128xf32>
    %24 = vector.shape_cast %15 : vector<128x128xf32> to vector<1x128x128xf32>
    tpu.vector_store %arg6[%c0_15, %c0_16, %c0_17], %24 {strides = array<i32>} : memref<1x128x128xf32, #tpu.memory_space<vmem>>, vector<1x128x128xf32>,
    return
  }
  func.func @transform_0(%arg0: i32, %arg1: i32) -> (i32, i32, i32) {
    %c0_i32 = arith.constant 0 : i32
    %c0_i32_0 = arith.constant 0 : i32
    return %arg0, %arg1, %c0_i32 : i32, i32, i32
  }
  func.func @transform_1(%arg0: i32, %arg1: i32) -> (i32, i32, i32) {
    %c0_i32 = arith.constant 0 : i32
    %c0_i32_0 = arith.constant 0 : i32
    %c0_i32_1 = arith.constant 0 : i32
    return %arg0, %c0_i32, %c0_i32_0 : i32, i32, i32
  }
  func.func @transform_2(%arg0: i32, %arg1: i32) -> (i32, i32, i32) {
    %c0_i32 = arith.constant 0 : i32
    %c0_i32_0 = arith.constant 0 : i32
    %c0_i32_1 = arith.constant 0 : i32
    return %arg0, %c0_i32, %c0_i32_0 : i32, i32, i32
  }
  func.func @transform_3(%arg0: i32, %arg1: i32) -> (i32, i32, i32) {
    %c0_i32 = arith.constant 0 : i32
    %c0_i32_0 = arith.constant 0 : i32
    return %arg0, %arg1, %c0_i32 : i32, i32, i32
  }
  func.func @transform_4(%arg0: i32, %arg1: i32) -> (i32, i32, i32) {
    %c0_i32 = arith.constant 0 : i32
    %c0_i32_0 = arith.constant 0 : i32
    return %arg0, %arg1, %c0_i32 : i32, i32, i32
  }
}

</mosaic_0001>

<bundles_post_ra>
// kernel: tpu_custom_call.1
= control target key start
LH: loop header
LB: loop body
LE: loop exit
PB: predicated region body
PF: predicated region fallthrough
CT: control target
= control target key end

     0   :  { %s2252_s0 = inlined_call_operand.hbm [shape: f32[2,128,128], index: 0, kind: input, shape index: {}]   ;;  %s2253_s1 = inlined_call_operand.hbm [shape: f32[2,128,128], index: 1, kind: input, shape index: {}]   ;;  %s2254_s2 = inlined_call_operand.hbm [shape: f32[2,128,128], index: 2, kind: input, shape index: {}]   ;;  %s2255_s3 = inlined_call_operand.hbm [shape: f32[2,128,128], index: 3, kind: output, shape index: {0}]   ;;  %s2256_s4 = inlined_call_operand.hbm [shape: f32[2,128,128], index: 4, kind: output, shape index: {1}]  }
   0x1   :  { %2268 = sst [smem:[#allocation19_spill]] %s2253_s1 }
   0x2   :  { %10 = vsyncpa [#allocation3], 0 }
   0x3   :  { %12 = vsyncpa [#allocation3 + $0x1], 0 }
   0x4   :  { %13 = vsyncpa [#allocation6], 0 }
   0x5   :  { %15 = vsyncpa [#allocation6 + $0x1], 0 }
   0x6   :  { %16 = vsyncpa [#allocation4], 0 }
   0x7   :  { %18 = vsyncpa [#allocation4 + $0x1], 0 }
   0x8   :  { %19 = vsyncpa [#allocation10], 0 }
   0x9   :  { %21 = vsyncpa [#allocation10 + $0x1], 0  ;;  %s1722_s15 = smov 0   ;;  %s1724_s16 = smov 0  }
   0xa   :  { %s1726_s17 = smov 0   ;;  %s1728_s18 = smov 0  }
   0xb   :  { %s1730_s19 = smov 0   ;;  %s1732_s20 = smov 0  }
   0xc LB: > { %2269 = sst [smem:[#allocation15_spill]] %s1682_s19  ;;  %s1753_s21 = sadd.s32 4294967295, %s1686_s20   ;;  %s1686_s20 = sphi %s1732_s20, %s27_s20   ;;  %s1682_s19 = sphi %s1730_s19, %s2294_s19   ;;  %s1678_s18 = sphi %s1728_s18, %s2293_s18   ;;  %s1674_s17 = sphi %s1726_s17, %s2297_s17   ;;  %s1670_s16 = sphi %s1724_s16, %s2296_s16   ;;  %s1666_s15 = sphi %s1722_s15, %s2295_s15  }
   0xd   : > { %2270 = sst [smem:[#allocation16_spill]] %s1686_s20  ;;  %s1062_s22 = sadd.s32 4294967294, %s1686_s20  }
   0xe   : > { %s39_s23 = sadd.s32 1, %s1682_s19  ;;  %s48_s24 = sadd.s32 1, %s1674_s17 }
   0xf   : > { %p41_p0 = scmp.ge.s32.totalorder %s39_s23, 2  ;;  %p55_p1 = scmp.ne.s32.totalorder %s1674_s17, %s1670_s16 }
  0x10   : > { %p56_p2 = scmp.eq.s32.totalorder %s1686_s20, 0  ;;  %p61_p3 = scmp.ne.s32.totalorder %s1670_s16, %s1666_s15 }
  0x11   : > { %s2299_s23 = smov (%p41_p0, %s39_s23), 0  ;;  %p62_p5 = scmp.eq.s32.totalorder %s1753_s21, 0 }
  0x12   : > { %2271 = sst [smem:[#allocation17_spill]] %s2299_s23  ;;  %p1765_p4 = por %p56_p2, %p55_p1 }
  0x13   : > { %s43_s26 = ssub.s32 %s1682_s19, %s2299_s23  ;;  %p139_p6 = scmp.eq.s32.totalorder %s1753_s21, 1 }
  0x14   : > { %p46_p7 = scmp.eq.s32.totalorder %s43_s26, 0  ;;  %p1773_p8 = por %p62_p5, %p61_p3 }
  0x15   : > { %p1777_p9 = por %p139_p6, %p55_p1  ;;  %p145_p10 = scmp.eq.s32.totalorder %s1062_s22, 1 }
  0x16   : > { %s2273_s27 = scalar_select %p1773_p8, 1, 0 }
  0x17   : > { %s2274_s28 = scalar_select %p1777_p9, 1, 0 }
  0x18   : > { %s1782_s29 = scalar_select %p46_p7, %s1674_s17, %s48_s24  }
  0x19   : > { %p1784_p11 = por %p145_p10, %p61_p3  ;;  %p1360_p13 = scmp.lt.s32.totalorder %s1686_s20, 2 }
  0x1a   : > { %2275 = sst [smem:[#allocation18_spill]] %s1782_s29  ;;  %s2257_s5 = sand.u32 1, %s1674_s17  }
  0x1b   : > { %s2276_s30 = scalar_select %p1784_p11, 1, 0 }
  0x1c   : > { %s1793_s6 = sshll.u32 %s2257_s5, 7  ;;  %s1796_s7 = sshll.u32 %s1682_s19, 11 }
  0x1d   : > { %p1800_p0 = pnand %p1360_p13, %p1765_p4  ;;  %s216_s9 = sand.u32 1, %s1686_s20  }
  0x1e   : > { %s2278_s1 = sld [smem:[#allocation19_spill]]  ;;  %s220_s13 = scalar_lea.vmem [#allocation5], %s1793_s6 }
  0x1f   : > { %s227_s14 = sshll.u32 %s220_s13, 4  ;;  %s1816_s22 = scalar_lea.sflag [#allocation6], %s216_s9  ;;  %s1813_s14 = int_to_ptr.vmem [resolvable:$true] %s227_s14 }
  0x20   : > { %p1822_p4 = pneg %p1800_p0 }
  0x24   : > { %s1809_s12 = scalar_lea.hbm %s2278_s1, %s1796_s7  ;;  %s1483_s11 = scalar_lea.hbm %s2278_s1, 4096 }
  0x25   : > { %s1478_s24 = scalar_lea.hbm %s1809_s12, 2048  ;;  %p1484_p7 = scmp.lt.u32.totalorder %s1809_s12, %s2278_s1 }
  0x26   : > { %p1479_p3 = scmp.ne.s32.totalorder %s1809_s12, %s1478_s24  ;;  %p1485_p10 = scmp.lt.u32.totalorder %s1483_s11, %s1478_s24 }
  0x27   : > { %p1487_p12 = scmp.lt.u32.totalorder %s1478_s24, %s1809_s12 }
  0x28   : > { %p1481_p5 = pnand %p1822_p4, %p1479_p3  ;;  %p1486_p13 = por %p1485_p10, %p1484_p7 }
  0x2a   : > { %p1482_p6 = pneg %p1481_p5  ;;  %p1488_p1 = por %p1487_p12, %p1486_p13 }
  0x2c   : > { %p1489_p2 = pnand %p1488_p1, %p1482_p6 }
  0x2e   : > { %1492 = shalt.err (!%p1489_p2)
}
  0x2f   : > { %s1493_s9 = scalar_lea.vmem %s1813_s14, 2048  ;;  %s1688_s26 = smov [#allocation5]  }
  0x30   : > { %p1494_p3 = scmp.ne.s32.totalorder %s1813_s14, %s1493_s9  ;;  %s1498_s10 = sshll.u32 %s1688_s26, 4  ;;  %s1499_s10 = int_to_ptr.vmem [resolvable:$false] %s1498_s10 }
  0x31   : > { %s1500_s5 = scalar_lea.vmem %s1499_s10, 4096  ;;  %p1501_p9 = scmp.lt.s32.totalorder %s1813_s14, %s1499_s10 }
  0x32   : > { %p1496_p5 = pnand %p1494_p3, %p1822_p4  ;;  %p1502_p8 = scmp.lt.s32.totalorder %s1500_s5, %s1493_s9 }
  0x34   : > { %p1497_p11 = pneg %p1496_p5  ;;  %p1503_p7 = por %p1502_p8, %p1501_p9 }
  0x36   : > { %p1504_p10 = pnand %p1503_p7, %p1497_p11 }
  0x38   : > { %1507 = shalt.err (!%p1504_p10)
}
  0x39   : > { %s2260_s24 = smov 128   ;;  %s2262_s11 = smov 8  }
  0x3a   : > { %1349 = dma.hbm_to_vmem [thread:$0]  (!%p1800_p0), %s1809_s12, 2048, %s1813_s14, %s1816_s22, %s2260_s24, %s2260_s24, %s2262_s11  }
  0x3b   : > { %p2280_p8 = scmp.lt.s32.totalorder %s1686_s20, 3  ;;  %p2281_p9 = scmp.ge.s32.totalorder %s1686_s20, 1 }
  0x3c   : > { %s1861_s10 = scalar_lea.hbm %s2252_s0, %s1796_s7  ;;  %s197_s5 = scalar_lea.vmem [#allocation2], %s1793_s6 }
  0x3d   : > { %p1853_p11 = pnand %p2281_p9, %p2280_p8  ;;  %s206_s1 = sshll.u32 %s197_s5, 4  ;;  %s1864_s1 = int_to_ptr.vmem [resolvable:$true] %s206_s1 }
  0x3e   : > { %s1870_s24 = scalar_lea.hbm %s2254_s2, %s1796_s7  ;;  %s2283_s11 = sand.u32 1, %s1674_s17  }
  0x3f   : > { %s2282_s13 = scalar_select %p1853_p11, 1, 0 }
  0x40   : > { %s1874_s23 = scalar_lea.sflag [#allocation3], %s2283_s11  ;;  %s1508_s19 = scalar_lea.hbm %s1861_s10, 2048 }
  0x41   : > { %p1509_p12 = scmp.ne.s32.totalorder %s1861_s10, %s1508_s19  ;;  %s1513_s29 = scalar_lea.hbm %s2252_s0, 4096 }
  0x42   : > { %p1514_p6 = scmp.lt.u32.totalorder %s1861_s10, %s2252_s0  ;;  %p1515_p13 = scmp.lt.u32.totalorder %s1513_s29, %s1508_s19 }
  0x43   : > { %p1511_p1 = pnand %p1509_p12, %p1822_p4  ;;  %p1517_p5 = scmp.lt.u32.totalorder %s1508_s19, %s1861_s10 }
  0x44   : > { %p1516_p3 = por %p1515_p13, %p1514_p6 }
  0x45   : > { %p1512_p2 = pneg %p1511_p1 }
  0x46   : > { %p1518_p7 = por %p1517_p5, %p1516_p3 }
  0x48   : > { %p1519_p10 = pnand %p1518_p7, %p1512_p2 }
  0x4a   : > { %1522 = shalt.err (!%p1519_p10)
}
  0x4b   : > { %s1523_s7 = scalar_lea.vmem %s1864_s1, 2048  ;;  %s1691_s11 = smov [#allocation2]  }
  0x4c   : > { %p1524_p8 = scmp.ne.s32.totalorder %s1864_s1, %s1523_s7  ;;  %s1528_s12 = sshll.u32 %s1691_s11, 4  ;;  %s1529_s12 = int_to_ptr.vmem [resolvable:$false] %s1528_s12 }
  0x4d   : > { %s1530_s20 = scalar_lea.vmem %s1529_s12, 4096  ;;  %p1531_p1 = scmp.lt.s32.totalorder %s1864_s1, %s1529_s12 }
  0x4e   : > { %p1526_p9 = pnand %p1524_p8, %p1822_p4  ;;  %p1532_p11 = scmp.lt.s32.totalorder %s1530_s20, %s1523_s7 }
  0x50   : > { %p1527_p12 = pneg %p1526_p9  ;;  %p1533_p6 = por %p1532_p11, %p1531_p1 }
  0x52   : > { %p1534_p13 = pnand %p1533_p6, %p1527_p12 }
  0x54   : > { %1537 = shalt.err (!%p1534_p13)
}
  0x55   : > { %s2284_s19 = smov 8   ;;  %s2285_s29 = smov 128  }
  0x56   : > { %1346 = dma.hbm_to_vmem [thread:$0]  (!%p1800_p0), %s1861_s10, 2048, %s1864_s1, %s1874_s23, %s2285_s29, %s2285_s29, %s2284_s19  }
  0x57   : > { %s241_s14 = scalar_lea.vmem [#allocation7], %s1793_s6  ;;  %s1538_s26 = scalar_lea.hbm %s1870_s24, 2048 }
  0x58   : > { %s248_s9 = sshll.u32 %s241_s14, 4  ;;  %p1539_p11 = scmp.ne.s32.totalorder %s1870_s24, %s1538_s26  ;;  %s1902_s9 = int_to_ptr.vmem [resolvable:$true] %s248_s9 }
  0x59   : > { %s1543_s11 = scalar_lea.hbm %s2254_s2, 4096  ;;  %p1544_p5 = scmp.lt.u32.totalorder %s1870_s24, %s2254_s2 }
  0x5a   : > { %p1541_p2 = pnand %p1539_p11, %p1822_p4  ;;  %p1545_p7 = scmp.lt.u32.totalorder %s1543_s11, %s1538_s26 }
  0x5b   : > { %p1547_p8 = scmp.lt.u32.totalorder %s1538_s26, %s1870_s24 }
  0x5c   : > { %p1542_p3 = pneg %p1541_p2  ;;  %p1546_p10 = por %p1545_p7, %p1544_p5 }
  0x5e   : > { %p1548_p9 = por %p1547_p8, %p1546_p10 }
  0x60   : > { %p1549_p12 = pnand %p1548_p9, %p1542_p3 }
  0x62   : > { %1552 = shalt.err (!%p1549_p12)
}
  0x63   : > { %s1553_s1 = scalar_lea.vmem %s1902_s9, 2048  ;;  %s1692_s23 = smov [#allocation7]  }
  0x64   : > { %p1554_p1 = scmp.ne.s32.totalorder %s1902_s9, %s1553_s1  ;;  %s1558_s6 = sshll.u32 %s1692_s23, 4  ;;  %s1559_s6 = int_to_ptr.vmem [resolvable:$false] %s1558_s6 }
  0x65   : > { %s1560_s10 = scalar_lea.vmem %s1559_s6, 4096  ;;  %p1561_p11 = scmp.lt.s32.totalorder %s1902_s9, %s1559_s6 }
  0x66   : > { %p1556_p6 = pnand %p1554_p1, %p1822_p4  ;;  %p1562_p2 = scmp.lt.s32.totalorder %s1560_s10, %s1553_s1 }
  0x68   : > { %p1557_p13 = pneg %p1556_p6  ;;  %p1563_p5 = por %p1562_p2, %p1561_p11 }
  0x6a   : > { %p1564_p7 = pnand %p1563_p5, %p1557_p13 }
  0x6c   : > { %1567 = shalt.err (!%p1564_p7)
}
  0x6d   : > { %1352 = dma.hbm_to_vmem [thread:$0]  (!%p1800_p0), %s1870_s24, 2048, %s1902_s9, %s1816_s22, %s2285_s29, %s2285_s29, %s2284_s19  }
  0x6e   : > { %p2286_p4 = scmp.ne.s32.totalorder %s2282_s13, 0 }
  0x6f   : > { %s1932_s25 = sand.u32 (!%p2286_p4), 1, %s1670_s16   ;;  %p2287_p3 = scmp.ne.s32.totalorder (!%p2286_p4), %s2273_s27, 0 }
  0x70   : > { %260 = sbr.rel (%p2286_p4) target bundleno = 974 (0x3ce), region = 32  ;;  %s1935_s14 = sshll.u32 (!%p2286_p4), %s1932_s25, 7 }
  0x71   : > { %s263_s8 = scalar_lea.sflag (!%p2286_p4), [#allocation3], %s1932_s25  ;;  %s1939_s26 = scalar_lea.vmem (!%p2286_p4), [#allocation2], %s1935_s14 }
  0x77   : > { %1649 = dma.done.wait (%p2287_p3), %s263_s8, 2048  }
  0x78   : > { %1651 = vsyncadd (%p2287_p3), %s263_s8, 4294965248  ;;  %s271_s22 = sand.u32 1, %s1753_s21   ;;  %s1947_s13 = scalar_lea.vmem [#allocation5], %s1935_s14 }
  0x79   : > { %s272_s24 = scalar_lea.sflag [#allocation6], %s271_s22 }
  0x7a   : > { %1653 = dma.done.wait (%p2287_p3), %s272_s24, 4096  }
  0x7b   : > { %1655 = vsyncadd (%p2287_p3), %s272_s24, 4294963200  ;;  %v359_v0 = vld [vmem:[%s1947_s13] sm:$0xff]  ;;  %v360_v1 = vld [vmem:[%s1947_s13 + $0x8] sm:$0xff]  ;;  %s2022_s21 = scalar_lea.vmem [#allocation7], %s1935_s14  ;;  %s2102_s27 = scalar_lea.vmem [#allocation9], %s1935_s14 }
  0x7c   : > { %v361_v2 = vld [vmem:[%s1947_s13 + $0x10] sm:$0xff]  ;;  %v1269_v3 = vpack.c.bf16 %v360_v1, %v359_v0  ;;  %v362_v4 = vld [vmem:[%s1947_s13 + $0x18] sm:$0xff]  ;;  %v327_v6 = vld [vmem:[%s1939_s26] sm:$0xff]  ;;  %s1091_s19 = sshll.u32 %s1678_s18, 11  ;;  %s896_s7 = sshll.u32 %s2102_s27, 4  ;;  %s2144_s7 = int_to_ptr.vmem [resolvable:$true] %s896_s7 }
  0x7d   : > { %v1273_v5 = vpack.c.bf16 %v362_v4, %v361_v2  ;;  %v363_v7 = vld [vmem:[%s1947_s13 + $0x20] sm:$0xff]  ;;  %v364_v8 = vld [vmem:[%s1947_s13 + $0x28] sm:$0xff]  ;;  %v343_v9 = vmul.f32 0.088388346, %v327_v6  ;;  %v365_v11 = vld [vmem:[%s1947_s13 + $0x30] sm:$0xff]  ;;  %s2141_s5 = scalar_lea.hbm %s2256_s4, %s1091_s19  ;;  %s863_s11 = scalar_lea.sflag [#allocation10], %s1932_s25 }
  0x7e   : > { %1270 = vmatprep.subr.bf16.mxu0 %v1269_v3  ;;  %v1277_v10 = vpack.c.bf16 %v364_v8, %v363_v7  ;;  %v366_v12 = vld [vmem:[%s1947_s13 + $0x38] sm:$0xff]  ;;  %v367_v14 = vld [vmem:[%s1947_s13 + $0x40] sm:$0xff]  ;;  %v368_v15 = vld [vmem:[%s1947_s13 + $0x48] sm:$0xff]  ;;  %s1568_s12 = scalar_lea.vmem %s2144_s7, 2048  ;;  %p2288_p10 = scmp.ne.s32.totalorder %s2274_s28, 0 }
  0x7f   : > { %1272 = vmatpush3.bf16.xpose.msra.mxu0 %v1269_v3  ;;  %1189 = vmatprep.mubr.f32.mxu0 %v343_v9  ;;  %v1281_v13 = vpack.c.bf16 %v366_v12, %v365_v11  ;;  %v1285_v16 = vpack.c.bf16 %v368_v15, %v367_v14  ;;  %v369_v17 = vld [vmem:[%s1947_s13 + $0x50] sm:$0xff]  ;;  %v370_v18 = vld [vmem:[%s1947_s13 + $0x58] sm:$0xff]  ;;  %v371_v20 = vld [vmem:[%s1947_s13 + $0x60] sm:$0xff]  ;;  %p1569_p0 = scmp.ne.s32.totalorder %s2144_s7, %s1568_s12  ;;  %s1693_s20 = smov [#allocation9]  }
  0x80   : > { %1274 = vmatprep.subr.bf16.mxu0 %v1273_v5  ;;  %v1289_v19 = vpack.c.bf16 %v370_v18, %v369_v17  ;;  %v372_v21 = vld [vmem:[%s1947_s13 + $0x68] sm:$0xff]  ;;  %v373_v23 = vld [vmem:[%s1947_s13 + $0x70] sm:$0xff]  ;;  %v374_v24 = vld [vmem:[%s1947_s13 + $0x78] sm:$0xff]  ;;  %s1572_s1 = sshll.u32 %s1693_s20, 4  ;;  %s1573_s1 = int_to_ptr.vmem [resolvable:$false] %s1572_s1 }
  0x81   : > { %v1293_v22 = vpack.c.bf16 %v372_v21, %v371_v20  ;;  %v1297_v25 = vpack.c.bf16 %v374_v24, %v373_v23  ;;  %v328_v26 = vld [vmem:[%s1939_s26 + $0x8] sm:$0xff]  ;;  %v329_v27 = vld [vmem:[%s1939_s26 + $0x10] sm:$0xff]  ;;  %v330_v30 = vld [vmem:[%s1939_s26 + $0x18] sm:$0xff]  ;;  %p1570_p8 = pnand %p1569_p0, %p2288_p10  ;;  %s1574_s23 = scalar_lea.vmem %s1573_s1, 4096 }
  0x82   : > { %v344_v28 = vmul.f32 0.088388346, %v328_v26  ;;  %v345_v29 = vmul.f32 0.088388346, %v329_v27  ;;  %v331_v31 = vld [vmem:[%s1939_s26 + $0x20] sm:$0xff]  ;;  %v332_v34 = vld [vmem:[%s1939_s26 + $0x28] sm:$0xff]  ;;  %p1575_p12 = scmp.lt.s32.totalorder %s2144_s7, %s1573_s1  ;;  %p1576_p1 = scmp.lt.s32.totalorder %s1574_s23, %s1568_s12 }
  0x83   : > { %v346_v32 = vmul.f32 0.088388346, %v330_v30  ;;  %v347_v33 = vmul.f32 0.088388346, %v331_v31  ;;  %v333_v35 = vld [vmem:[%s1939_s26 + $0x30] sm:$0xff]  ;;  %v334_v38 = vld [vmem:[%s1939_s26 + $0x38] sm:$0xff]  ;;  %p1571_p9 = pneg %p1570_p8 }
  0x84   : > { %v348_v36 = vmul.f32 0.088388346, %v332_v34  ;;  %v349_v37 = vmul.f32 0.088388346, %v333_v35  ;;  %v335_v39 = vld [vmem:[%s1939_s26 + $0x40] sm:$0xff]  ;;  %v336_v42 = vld [vmem:[%s1939_s26 + $0x48] sm:$0xff]  ;;  %p1577_p6 = por %p1576_p1, %p1575_p12 }
  0x85   : > { %v350_v40 = vmul.f32 0.088388346, %v334_v38  ;;  %v351_v41 = vmul.f32 0.088388346, %v335_v39  ;;  %v337_v43 = vld [vmem:[%s1939_s26 + $0x50] sm:$0xff]  ;;  %v338_v46 = vld [vmem:[%s1939_s26 + $0x58] sm:$0xff] }
  0x86   : > { %v352_v44 = vmul.f32 0.088388346, %v336_v42  ;;  %v353_v45 = vmul.f32 0.088388346, %v337_v43  ;;  %v339_v47 = vld [vmem:[%s1939_s26 + $0x60] sm:$0xff]  ;;  %v340_v50 = vld [vmem:[%s1939_s26 + $0x68] sm:$0xff]  ;;  %p1578_p13 = pnand %p1577_p6, %p1571_p9 }
  0x87   : > { %1276 = vmatpush3.bf16.xpose.msra.mxu0 %v1273_v5  ;;  %v354_v48 = vmul.f32 0.088388346, %v338_v46  ;;  %v355_v49 = vmul.f32 0.088388346, %v339_v47  ;;  %v341_v51 = vld [vmem:[%s1939_s26 + $0x70] sm:$0xff]  ;;  %v342_v54 = vld [vmem:[%s1939_s26 + $0x78] sm:$0xff] }
  0x88   : > { %1278 = vmatprep.subr.bf16.mxu0 %v1277_v10  ;;  %v356_v52 = vmul.f32 0.088388346, %v340_v50  ;;  %v357_v53 = vmul.f32 0.088388346, %v341_v51  ;;  %v358_v55 = vmul.f32 0.088388346, %v342_v54 }
  0x89   : > { %v664_v8 = vld [vmem:[%s2022_s21] sm:$0xff]  ;;  %v665_v9 = vld [vmem:[%s2022_s21 + $0x8] sm:$0xff]  ;;  %v667_v12 = vld [vmem:[%s2022_s21 + $0x18] sm:$0xff] }
  0x8a   : > { %v1301_v11 = vpack.c.bf16 %v665_v9, %v664_v8  ;;  %v668_v14 = vld [vmem:[%s2022_s21 + $0x20] sm:$0xff]  ;;  %v669_v15 = vld [vmem:[%s2022_s21 + $0x28] sm:$0xff]  ;;  %v670_v17 = vld [vmem:[%s2022_s21 + $0x30] sm:$0xff] }
  0x8b   : > { %v671_v18 = vld [vmem:[%s2022_s21 + $0x38] sm:$0xff] }
  0x8c   : > { %1302 = vmatprep.subr.bf16.mxu1 %v1301_v11 }
  0x8d   : > { %1304 = vmatpush3.bf16.msra.mxu1 %v1301_v11 }
  0x8f   : > { %1280 = vmatpush3.bf16.xpose.msra.mxu0 %v1277_v10  ;;  %v666_v10 = vld [vmem:[%s2022_s21 + $0x10] sm:$0xff] }
  0x90   : > { %1282 = vmatprep.subr.bf16.mxu0 %v1281_v13 }
  0x97   : > { %1284 = vmatpush3.bf16.xpose.msra.mxu0 %v1281_v13  ;;  %v1305_v13 = vpack.c.bf16 %v667_v12, %v666_v10  ;;  %v673_v10 = vld [vmem:[%s2022_s21 + $0x48] sm:$0xff] }
  0x98   : > { %1286 = vmatprep.subr.bf16.mxu0 %v1285_v16 }
  0x99   : > { %1306 = vmatprep.subr.bf16.mxu1 %v1305_v13 }
  0x9a   : > { %1308 = vmatpush3.bf16.msra.mxu1 %v1305_v13 }
  0x9f   : > { %1288 = vmatpush3.bf16.xpose.msra.mxu0 %v1285_v16  ;;  %v1309_v16 = vpack.c.bf16 %v669_v15, %v668_v14 }
  0xa0   : > { %1290 = vmatprep.subr.bf16.mxu0 %v1289_v19 }
  0xa1   : > { %1310 = vmatprep.subr.bf16.mxu1 %v1309_v16 }
  0xa2   : > { %1312 = vmatpush3.bf16.msra.mxu1 %v1309_v16 }
  0xa7   : > { %1292 = vmatpush3.bf16.xpose.msra.mxu0 %v1289_v19  ;;  %v1313_v19 = vpack.c.bf16 %v671_v18, %v670_v17  ;;  %v675_v17 = vld [vmem:[%s2022_s21 + $0x58] sm:$0xff] }
  0xa8   : > { %1294 = vmatprep.subr.bf16.mxu0 %v1293_v22 }
  0xa9   : > { %1314 = vmatprep.subr.bf16.mxu1 %v1313_v19 }
  0xaa   : > { %1316 = vmatpush3.bf16.msra.mxu1 %v1313_v19 }
  0xaf   : > { %1296 = vmatpush3.bf16.xpose.msra.mxu0 %v1293_v22 }
  0xb0   : > { %1298 = vmatprep.subr.bf16.mxu0 %v1297_v25 }
  0xb7   : > { %1300 = vmatpush3.bf16.xpose.msra.mxu0 %v1297_v25 }
  0xbe   : > { %1190 = vmatmul.mubr.f32.vlgmr.msra.gmra.mrb[0].mxu0 %v344_v28 }
  0xbf   : > { %1192 = vmatprep.mubr.f32.mxu0 %v345_v29 }
  0xc2   : > { %1193 = vmatmul.mubr.f32.gmra.mrb[2].mxu0 %v346_v32 }
  0xc3   : > { %1195 = vmatprep.mubr.f32.mxu0 %v347_v33 }
  0xc6   : > { %1196 = vmatmul.mubr.f32.gmra.mrb[4].mxu0 %v348_v36 }
  0xc7   : > { %1198 = vmatprep.mubr.f32.mxu0 %v349_v37 }
  0xca   : > { %1199 = vmatmul.mubr.f32.gmra.mrb[6].mxu0 %v350_v40 }
  0xcb   : > { %1201 = vmatprep.mubr.f32.mxu0 %v351_v41 }
  0xce   : > { %1202 = vmatmul.mubr.f32.gmra.mrb[8].mxu0 %v352_v44 }
  0xcf   : > { %1204 = vmatprep.mubr.f32.mxu0 %v353_v45 }
  0xd2   : > { %1205 = vmatmul.mubr.f32.gmra.mrb[10].mxu0 %v354_v48 }
  0xd3   : > { %1207 = vmatprep.mubr.f32.mxu0 %v355_v49 }
  0xd6   : > { %1208 = vmatmul.mubr.f32.gmra.mrb[12].mxu0 %v356_v52 }
  0xd7   : > { %1210 = vmatprep.mubr.f32.mxu0 %v357_v53 }
  0xda   : > { %1211 = vmatmul.mubr.f32.gmra.mrb[14].mxu0 %v358_v55 }
 0x191   : > { %v1191_v56 = vpop.f32.mrb[0].mxu0 }
 0x192   : > { %v441_v57 = vpop.f32.mrb[1].mxu0 }
 0x193   : > { %520 = vmax.xlane.f32.xlu0 %v441_v57 }
 0x195   : > { %v1985_v58 = vpop.f32.mrb[2].mxu0 }
 0x196   : > { %v451_v59 = vpop.f32.mrb[3].mxu0 }
 0x197   : > { %522 = vmax.xlane.f32.xlu0 %v1191_v56  ;;  %524 = vmax.xlane.f32.xlu1 %v451_v59 }
 0x199   : > { %v1987_v60 = vpop.f32.mrb[4].mxu0 }
 0x19a   : > { %v461_v61 = vpop.f32.mrb[5].mxu0 }
 0x19b   : > { %526 = vmax.xlane.f32.xlu1 %v1985_v58  ;;  %528 = vmax.xlane.f32.xlu0 %v461_v61 }
 0x19d   : > { %v1990_v62 = vpop.f32.mrb[6].mxu0 }
 0x19e   : > { %v1992_v63 = vpop.f32.mrb[7].mxu0 }
 0x19f   : > { %530 = vmax.xlane.f32.xlu1 %v1987_v60  ;;  %532 = vmax.xlane.f32.xlu0 %v1992_v63 }
 0x1a1   : > { %v1996_v0 = vpop.f32.mrb[8].mxu0 }
 0x1a2   : > { %v1998_v1 = vpop.f32.mrb[9].mxu0 }
 0x1a3   : > { %534 = vmax.xlane.f32.xlu1 %v1990_v62  ;;  %536 = vmax.xlane.f32.xlu0 %v1998_v1 }
 0x1a5   : > { %v2002_v2 = vpop.f32.mrb[10].mxu0 }
 0x1a6   : > { %v2004_v3 = vpop.f32.mrb[11].mxu0 }
 0x1a7   : > { %538 = vmax.xlane.f32.xlu1 %v1996_v0  ;;  %540 = vmax.xlane.f32.xlu0 %v2004_v3 }
 0x1a9   : > { %v2008_v4 = vpop.f32.mrb[12].mxu0 }
 0x1aa   : > { %v2010_v5 = vpop.f32.mrb[13].mxu0 }
 0x1ab   : > { %542 = vmax.xlane.f32.xlu1 %v2002_v2  ;;  %544 = vmax.xlane.f32.xlu0 %v2010_v5 }
 0x1ad   : > { %v2014_v6 = vpop.f32.mrb[14].mxu0 }
 0x1ae   : > { %v2016_v7 = vpop.f32.mrb[15].mxu0 }
 0x1af   : > { %546 = vmax.xlane.f32.xlu1 %v2008_v4  ;;  %548 = vmax.xlane.f32.xlu0 %v2016_v7 }
 0x1b3   : > { %550 = vmax.xlane.f32.xlu1 %v2014_v6 }
 0x220   : > { %v521_v20 = vpop.xlane.xlu0 %520 }
 0x221   : > { %v552_v21 = vsub.f32 %v441_v57, %v521_v20 }
 0x223   : > { %v568_v22 = vmul.f32 1.442695, %v552_v21 }
 0x224   : > { %v523_v23 = vpop.xlane.xlu0 %522  ;;  %v525_v24 = vpop.xlane.xlu1 %524 }
 0x225   : > { %1414 = vpow2.f32 %v568_v22  ;;  %v553_v25 = vsub.f32 %v1191_v56, %v523_v23  ;;  %v554_v26 = vsub.f32 %v451_v59, %v525_v24  ;;  %v677_v22 = vld [vmem:[%s2022_s21 + $0x68] sm:$0xff] }
 0x227   : > { %v570_v27 = vmul.f32 1.442695, %v553_v25  ;;  %v572_v28 = vmul.f32 1.442695, %v554_v26  ;;  %v678_v26 = vld [vmem:[%s2022_s21 + $0x70] sm:$0xff] }
 0x228   : > { %v527_v29 = vpop.xlane.xlu1 %526  ;;  %v529_v30 = vpop.xlane.xlu0 %528 }
 0x229   : > { %1416 = vpow2.f32 %v570_v27  ;;  %v555_v31 = vsub.f32 %v1985_v58, %v527_v29  ;;  %v556_v32 = vsub.f32 %v461_v61, %v529_v30  ;;  %v679_v27 = vld [vmem:[%s2022_s21 + $0x78] sm:$0xff] }
 0x22a   : > { %1418 = vpow2.f32 %v572_v28  ;;  %v1329_v28 = vpack.c.bf16 %v679_v27, %v678_v26 }
 0x22b   : > { %v574_v33 = vmul.f32 1.442695, %v555_v31  ;;  %v576_v34 = vmul.f32 1.442695, %v556_v32 }
 0x22c   : > { %v531_v35 = vpop.xlane.xlu1 %530  ;;  %v533_v36 = vpop.xlane.xlu0 %532 }
 0x22d   : > { %1420 = vpow2.f32 %v574_v33  ;;  %v557_v37 = vsub.f32 %v1987_v60, %v531_v35  ;;  %v558_v38 = vsub.f32 %v1992_v63, %v533_v36 }
 0x22e   : > { %1422 = vpow2.f32 %v576_v34 }
 0x22f   : > { %v2035_v39 = vpop.eup %1414  ;;  %v578_v40 = vmul.f32 1.442695, %v557_v37  ;;  %v580_v41 = vmul.f32 1.442695, %v558_v38 }
 0x230   : > { %v535_v42 = vpop.xlane.xlu1 %534  ;;  %v537_v43 = vpop.xlane.xlu0 %536  ;;  %600 = vadd.xlane.f32.xlu0 %v2035_v39 }
 0x231   : > { %1424 = vpow2.f32 %v578_v40  ;;  %v559_v44 = vsub.f32 %v1990_v62, %v535_v42  ;;  %v560_v45 = vsub.f32 %v1998_v1, %v537_v43 }
 0x232   : > { %1426 = vpow2.f32 %v580_v41 }
 0x233   : > { %v2040_v46 = vpop.eup %1416  ;;  %v582_v47 = vmul.f32 1.442695, %v559_v44  ;;  %v584_v48 = vmul.f32 1.442695, %v560_v45 }
 0x234   : > { %v2042_v49 = vpop.eup %1418  ;;  %v539_v50 = vpop.xlane.xlu1 %538  ;;  %602 = vadd.xlane.f32.xlu1 %v2040_v46 }
 0x235   : > { %v541_v51 = vpop.xlane.xlu0 %540  ;;  %1428 = vpow2.f32 %v582_v47  ;;  %v561_v52 = vsub.f32 %v1996_v0, %v539_v50  ;;  %604 = vadd.xlane.f32.xlu0 %v2042_v49 }
 0x236   : > { %v562_v53 = vsub.f32 %v2004_v3, %v541_v51  ;;  %1430 = vpow2.f32 %v584_v48 }
 0x237   : > { %v2048_v54 = vpop.eup %1420  ;;  %v586_v55 = vmul.f32 1.442695, %v561_v52 }
 0x238   : > { %v588_v56 = vmul.f32 1.442695, %v562_v53  ;;  %v2050_v57 = vpop.eup %1422  ;;  %v543_v58 = vpop.xlane.xlu1 %542  ;;  %606 = vadd.xlane.f32.xlu1 %v2048_v54 }
 0x239   : > { %v545_v59 = vpop.xlane.xlu0 %544  ;;  %1432 = vpow2.f32 %v586_v55  ;;  %v563_v60 = vsub.f32 %v2002_v2, %v543_v58  ;;  %608 = vadd.xlane.f32.xlu0 %v2050_v57 }
 0x23a   : > { %v564_v61 = vsub.f32 %v2010_v5, %v545_v59  ;;  %1434 = vpow2.f32 %v588_v56  ;;  %v672_v5 = vld [vmem:[%s2022_s21 + $0x40] sm:$0xff] }
 0x23b   : > { %v2056_v62 = vpop.eup %1424  ;;  %v590_v63 = vmul.f32 1.442695, %v563_v60  ;;  %v1317_v11 = vpack.c.bf16 %v673_v10, %v672_v5 }
 0x23c   : > { %v592_v0 = vmul.f32 1.442695, %v564_v61  ;;  %v2058_v1 = vpop.eup %1426  ;;  %v547_v3 = vpop.xlane.xlu1 %546  ;;  %610 = vadd.xlane.f32.xlu1 %v2056_v62 }
 0x23d   : > { %v549_v8 = vpop.xlane.xlu0 %548  ;;  %1436 = vpow2.f32 %v590_v63  ;;  %v565_v9 = vsub.f32 %v2008_v4, %v547_v3  ;;  %612 = vadd.xlane.f32.xlu0 %v2058_v1  ;;  %1318 = vmatprep.subr.bf16.mxu1 %v1317_v11 }
 0x23e   : > { %v566_v2 = vsub.f32 %v2016_v7, %v549_v8  ;;  %1438 = vpow2.f32 %v592_v0  ;;  %1320 = vmatpush3.bf16.msra.mxu1 %v1317_v11  ;;  %v674_v7 = vld [vmem:[%s2022_s21 + $0x50] sm:$0xff] }
 0x23f   : > { %v2066_v12 = vpop.eup %1428  ;;  %v594_v13 = vmul.f32 1.442695, %v565_v9  ;;  %v1321_v18 = vpack.c.bf16 %v675_v17, %v674_v7 }
 0x240   : > { %v596_v14 = vmul.f32 1.442695, %v566_v2  ;;  %v2068_v15 = vpop.eup %1430  ;;  %614 = vadd.xlane.f32.xlu1 %v2066_v12  ;;  %v551_v16 = vpop.xlane.xlu1 %550 }
 0x241   : > { %1440 = vpow2.f32 %v594_v13  ;;  %v567_v4 = vsub.f32 %v2014_v6, %v551_v16  ;;  %616 = vadd.xlane.f32.xlu0 %v2068_v15  ;;  %1322 = vmatprep.subr.bf16.mxu1 %v1321_v18  ;;  %v676_v6 = vld [vmem:[%s2022_s21 + $0x60] sm:$0xff] }
 0x242   : > { %1442 = vpow2.f32 %v596_v14  ;;  %1324 = vmatpush3.bf16.msra.mxu1 %v1321_v18  ;;  %v1325_v23 = vpack.c.bf16 %v677_v22, %v676_v6 }
 0x243   : > { %v2075_v19 = vpop.eup %1432  ;;  %v598_v20 = vmul.f32 1.442695, %v567_v4 }
 0x244   : > { %v2077_v21 = vpop.eup %1434  ;;  %618 = vadd.xlane.f32.xlu1 %v2075_v19  ;;  %1326 = vmatprep.subr.bf16.mxu1 %v1325_v23 }
 0x245   : > { %1444 = vpow2.f32 %v598_v20  ;;  %620 = vadd.xlane.f32.xlu0 %v2077_v21 }
 0x246   : > { %1328 = vmatpush3.bf16.msra.mxu1 %v1325_v23 }
 0x247   : > { %v2083_v24 = vpop.eup %1436  ;;  %1330 = vmatprep.subr.bf16.mxu1 %v1329_v28 }
 0x248   : > { %v2085_v25 = vpop.eup %1438  ;;  %622 = vadd.xlane.f32.xlu1 %v2083_v24 }
 0x249   : > { %624 = vadd.xlane.f32.xlu0 %v2085_v25 }
 0x24a   : > { %1332 = vmatpush3.bf16.msra.mxu1 %v1329_v28 }
 0x24b   : > { %v2091_v29 = vpop.eup %1440 }
 0x24c   : > { %v2093_v30 = vpop.eup %1442  ;;  %626 = vadd.xlane.f32.xlu1 %v2091_v29 }
 0x24d   : > { %628 = vadd.xlane.f32.xlu0 %v2093_v30 }
 0x24f   : > { %v2097_v31 = vpop.eup %1444 }
 0x250   : > { %630 = vadd.xlane.f32.xlu1 %v2097_v31 }
 0x2bd   : > { %v601_v32 = vpop.xlane.xlu0 %600 }
 0x2be   : > { %1446 = vrcp.f32 %v601_v32 }
 0x2c1   : > { %v603_v33 = vpop.xlane.xlu1 %602 }
 0x2c2   : > { %1448 = vrcp.f32 %v603_v33  ;;  %v605_v34 = vpop.xlane.xlu0 %604 }
 0x2c3   : > { %1450 = vrcp.f32 %v605_v34 }
 0x2c5   : > { %v607_v35 = vpop.xlane.xlu1 %606 }
 0x2c6   : > { %1452 = vrcp.f32 %v607_v35  ;;  %v609_v36 = vpop.xlane.xlu0 %608 }
 0x2c7   : > { %1454 = vrcp.f32 %v609_v36 }
 0x2c8   : > { %v1447_v37 = vpop.eup %1446 }
 0x2c9   : > { %v611_v38 = vpop.xlane.xlu1 %610  ;;  %v633_v40 = vmul.f32 %v1447_v37, %v2035_v39 }
 0x2ca   : > { %1456 = vrcp.f32 %v611_v38  ;;  %v613_v41 = vpop.xlane.xlu0 %612 }
 0x2cb   : > { %1458 = vrcp.f32 %v613_v41  ;;  %1245 = vmatprep.mubr.f32.mxu1 %v633_v40  ;;  %841 = vst [vmem:[%s2102_s27] sm:$0xff] %v633_v40 }
 0x2cc   : > { %v1449_v42 = vpop.eup %1448 }
 0x2cd   : > { %v1451_v43 = vpop.eup %1450  ;;  %v615_v44 = vpop.xlane.xlu1 %614  ;;  %v635_v45 = vmul.f32 %v1449_v42, %v2040_v46 }
 0x2ce   : > { %1460 = vrcp.f32 %v615_v44  ;;  %v617_v47 = vpop.xlane.xlu0 %616  ;;  %v637_v39 = vmul.f32 %v1451_v43, %v2042_v49 }
 0x2cf   : > { %1462 = vrcp.f32 %v617_v47  ;;  %1246 = vmatmul.mubr.f32.vlgmr.msra.gmra.mrb[0].mxu1 %v635_v45  ;;  %842 = vst [vmem:[%s2102_s27 + $0x8] sm:$0xff] %v635_v45 }
 0x2d0   : > { %v1453_v48 = vpop.eup %1452  ;;  %1248 = vmatprep.mubr.f32.mxu1 %v637_v39  ;;  %843 = vst [vmem:[%s2102_s27 + $0x10] sm:$0xff] %v637_v39 }
 0x2d1   : > { %v1455_v50 = vpop.eup %1454  ;;  %v619_v51 = vpop.xlane.xlu1 %618  ;;  %v639_v52 = vmul.f32 %v1453_v48, %v2048_v54 }
 0x2d2   : > { %1464 = vrcp.f32 %v619_v51  ;;  %v621_v53 = vpop.xlane.xlu0 %620  ;;  %v641_v46 = vmul.f32 %v1455_v50, %v2050_v57 }
 0x2d3   : > { %1466 = vrcp.f32 %v621_v53  ;;  %1249 = vmatmul.mubr.f32.gmra.mrb[2].mxu1 %v639_v52  ;;  %844 = vst [vmem:[%s2102_s27 + $0x18] sm:$0xff] %v639_v52 }
 0x2d4   : > { %v1457_v49 = vpop.eup %1456  ;;  %1251 = vmatprep.mubr.f32.mxu1 %v641_v46  ;;  %845 = vst [vmem:[%s2102_s27 + $0x20] sm:$0xff] %v641_v46 }
 0x2d5   : > { %v1459_v55 = vpop.eup %1458  ;;  %v623_v56 = vpop.xlane.xlu1 %622  ;;  %v643_v58 = vmul.f32 %v1457_v49, %v2056_v62 }
 0x2d6   : > { %1468 = vrcp.f32 %v623_v56  ;;  %v625_v59 = vpop.xlane.xlu0 %624  ;;  %v645_v54 = vmul.f32 %v1459_v55, %v2058_v1 }
 0x2d7   : > { %1470 = vrcp.f32 %v625_v59  ;;  %1252 = vmatmul.mubr.f32.gmra.mrb[4].mxu1 %v643_v58  ;;  %846 = vst [vmem:[%s2102_s27 + $0x28] sm:$0xff] %v643_v58 }
 0x2d8   : > { %v1461_v57 = vpop.eup %1460  ;;  %1254 = vmatprep.mubr.f32.mxu1 %v645_v54  ;;  %847 = vst [vmem:[%s2102_s27 + $0x30] sm:$0xff] %v645_v54 }
 0x2d9   : > { %v1463_v60 = vpop.eup %1462  ;;  %v627_v61 = vpop.xlane.xlu1 %626  ;;  %v647_v63 = vmul.f32 %v1461_v57, %v2066_v12 }
 0x2da   : > { %1472 = vrcp.f32 %v627_v61  ;;  %v629_v0 = vpop.xlane.xlu0 %628  ;;  %v649_v62 = vmul.f32 %v1463_v60, %v2068_v15 }
 0x2db   : > { %1474 = vrcp.f32 %v629_v0  ;;  %1255 = vmatmul.mubr.f32.gmra.mrb[6].mxu1 %v647_v63  ;;  %848 = vst [vmem:[%s2102_s27 + $0x38] sm:$0xff] %v647_v63 }
 0x2dc   : > { %v1465_v1 = vpop.eup %1464  ;;  %1257 = vmatprep.mubr.f32.mxu1 %v649_v62  ;;  %849 = vst [vmem:[%s2102_s27 + $0x40] sm:$0xff] %v649_v62 }
 0x2dd   : > { %v1467_v3 = vpop.eup %1466  ;;  %v631_v8 = vpop.xlane.xlu1 %630  ;;  %v651_v9 = vmul.f32 %v1465_v1, %v2075_v19 }
 0x2de   : > { %1476 = vrcp.f32 %v631_v8  ;;  %v653_v2 = vmul.f32 %v1467_v3, %v2077_v21 }
 0x2df   : > { %1258 = vmatmul.mubr.f32.gmra.mrb[8].mxu1 %v651_v9  ;;  %850 = vst [vmem:[%s2102_s27 + $0x48] sm:$0xff] %v651_v9 }
 0x2e0   : > { %v1469_v5 = vpop.eup %1468  ;;  %1260 = vmatprep.mubr.f32.mxu1 %v653_v2  ;;  %851 = vst [vmem:[%s2102_s27 + $0x50] sm:$0xff] %v653_v2 }
 0x2e1   : > { %v1471_v10 = vpop.eup %1470  ;;  %v655_v11 = vmul.f32 %v1469_v5, %v2083_v24 }
 0x2e2   : > { %v657_v12 = vmul.f32 %v1471_v10, %v2085_v25 }
 0x2e3   : > { %1261 = vmatmul.mubr.f32.gmra.mrb[10].mxu1 %v655_v11  ;;  %852 = vst [vmem:[%s2102_s27 + $0x58] sm:$0xff] %v655_v11 }
 0x2e4   : > { %v1473_v13 = vpop.eup %1472  ;;  %1263 = vmatprep.mubr.f32.mxu1 %v657_v12  ;;  %853 = vst [vmem:[%s2102_s27 + $0x60] sm:$0xff] %v657_v12 }
 0x2e5   : > { %v1475_v14 = vpop.eup %1474  ;;  %v659_v15 = vmul.f32 %v1473_v13, %v2091_v29 }
 0x2e6   : > { %v661_v16 = vmul.f32 %v1475_v14, %v2093_v30 }
 0x2e7   : > { %1264 = vmatmul.mubr.f32.gmra.mrb[12].mxu1 %v659_v15  ;;  %854 = vst [vmem:[%s2102_s27 + $0x68] sm:$0xff] %v659_v15 }
 0x2e8   : > { %v1477_v4 = vpop.eup %1476  ;;  %1266 = vmatprep.mubr.f32.mxu1 %v661_v16  ;;  %855 = vst [vmem:[%s2102_s27 + $0x70] sm:$0xff] %v661_v16 }
 0x2e9   : > { %v663_v7 = vmul.f32 %v1477_v4, %v2097_v31 }
 0x2eb   : > { %1267 = vmatmul.mubr.f32.gmra.mrb[14].mxu1 %v663_v7  ;;  %856 = vst [vmem:[%s2102_s27 + $0x78] sm:$0xff] %v663_v7 }
 0x2ec   : > { %1581 = shalt.err (!%p1578_p13)
}
 0x2ed   : > { %s1582_s6 = scalar_lea.hbm %s2141_s5, 2048  ;;  %s1586_s26 = scalar_lea.hbm %s2256_s4, 4096 }
 0x2ee   : > { %p1583_p11 = scmp.ne.s32.totalorder %s2141_s5, %s1582_s6  ;;  %p1587_p7 = scmp.lt.u32.totalorder %s2141_s5, %s2256_s4 }
 0x2ef   : > { %p1588_p4 = scmp.lt.u32.totalorder %s1586_s26, %s1582_s6  ;;  %p1590_p0 = scmp.lt.u32.totalorder %s1582_s6, %s2141_s5 }
 0x2f0   : > { %p1584_p2 = pnand %p1583_p11, %p2288_p10 }
 0x2f1   : > { %p1589_p3 = por %p1588_p4, %p1587_p7 }
 0x2f2   : > { %p1585_p5 = pneg %p1584_p2 }
 0x2f3   : > { %p1591_p8 = por %p1590_p0, %p1589_p3 }
 0x2f5   : > { %p1592_p9 = pnand %p1591_p8, %p1585_p5 }
 0x2f7   : > { %1595 = shalt.err (!%p1592_p9)
}
 0x2f8   : > { %s1694_s13 = smov 128   ;;  %s1695_s21 = smov 8  }
 0x2f9   : > { %1340 = dma.vmem_to_hbm [thread:$0]  (%p2288_p10), %s2144_s7, 2048, %s2141_s5, %s863_s11, %s1694_s13, %s1694_s13, %s1695_s21  }
 0x2fa   : > { %s2174_s27 = scalar_lea.vmem [#allocation8], %s1935_s14  ;;  %s2196_s5 = scalar_lea.hbm %s2255_s3, %s1091_s19 }
 0x2fb   : > { %s878_s14 = sshll.u32 %s2174_s27, 4  ;;  %s858_s7 = scalar_lea.sflag [#allocation4], %s1932_s25  ;;  %s2198_s14 = int_to_ptr.vmem [resolvable:$true] %s878_s14 }
 0x2fc   : > { %s1596_s11 = scalar_lea.vmem %s2198_s14, 2048  ;;  %s1696_s18 = smov [#allocation8]  }
 0x2fd   : > { %p1597_p12 = scmp.ne.s32.totalorder %s2198_s14, %s1596_s11  ;;  %s1600_s12 = sshll.u32 %s1696_s18, 4  ;;  %s1601_s12 = int_to_ptr.vmem [resolvable:$false] %s1600_s12 }
 0x2fe   : > { %s1602_s20 = scalar_lea.vmem %s1601_s12, 4096  ;;  %p1603_p13 = scmp.lt.s32.totalorder %s2198_s14, %s1601_s12 }
 0x2ff   : > { %p1598_p1 = pnand %p1597_p12, %p2288_p10  ;;  %p1604_p11 = scmp.lt.s32.totalorder %s1602_s20, %s1596_s11 }
 0x301   : > { %p1599_p6 = pneg %p1598_p1  ;;  %p1605_p2 = por %p1604_p11, %p1603_p13 }
 0x303   : > { %p1606_p5 = pnand %p1605_p2, %p1599_p6 }
 0x3a2   : > { %v1247_v17 = vpop.f32.mrb[0].mxu1 }
 0x3a3   : > { %826 = vst [vmem:[%s2174_s27 + $0x8] sm:$0xff] %v1247_v17  ;;  %v746_v18 = vpop.f32.mrb[1].mxu1 }
 0x3a4   : > { %825 = vst [vmem:[%s2174_s27] sm:$0xff] %v746_v18 }
 0x3a6   : > { %v1250_v19 = vpop.f32.mrb[2].mxu1 }
 0x3a7   : > { %828 = vst [vmem:[%s2174_s27 + $0x18] sm:$0xff] %v1250_v19  ;;  %v756_v20 = vpop.f32.mrb[3].mxu1 }
 0x3a8   : > { %827 = vst [vmem:[%s2174_s27 + $0x10] sm:$0xff] %v756_v20 }
 0x3aa   : > { %v1253_v21 = vpop.f32.mrb[4].mxu1 }
 0x3ab   : > { %830 = vst [vmem:[%s2174_s27 + $0x28] sm:$0xff] %v1253_v21  ;;  %v766_v6 = vpop.f32.mrb[5].mxu1 }
 0x3ac   : > { %829 = vst [vmem:[%s2174_s27 + $0x20] sm:$0xff] %v766_v6 }
 0x3ae   : > { %v1256_v22 = vpop.f32.mrb[6].mxu1 }
 0x3af   : > { %832 = vst [vmem:[%s2174_s27 + $0x38] sm:$0xff] %v1256_v22  ;;  %v776_v23 = vpop.f32.mrb[7].mxu1 }
 0x3b0   : > { %831 = vst [vmem:[%s2174_s27 + $0x30] sm:$0xff] %v776_v23 }
 0x3b2   : > { %v1259_v24 = vpop.f32.mrb[8].mxu1 }
 0x3b3   : > { %834 = vst [vmem:[%s2174_s27 + $0x48] sm:$0xff] %v1259_v24  ;;  %v786_v25 = vpop.f32.mrb[9].mxu1 }
 0x3b4   : > { %833 = vst [vmem:[%s2174_s27 + $0x40] sm:$0xff] %v786_v25 }
 0x3b6   : > { %v1262_v26 = vpop.f32.mrb[10].mxu1 }
 0x3b7   : > { %836 = vst [vmem:[%s2174_s27 + $0x58] sm:$0xff] %v1262_v26  ;;  %v796_v27 = vpop.f32.mrb[11].mxu1 }
 0x3b8   : > { %835 = vst [vmem:[%s2174_s27 + $0x50] sm:$0xff] %v796_v27 }
 0x3ba   : > { %v1265_v28 = vpop.f32.mrb[12].mxu1 }
 0x3bb   : > { %838 = vst [vmem:[%s2174_s27 + $0x68] sm:$0xff] %v1265_v28  ;;  %v806_v29 = vpop.f32.mrb[13].mxu1 }
 0x3bc   : > { %837 = vst [vmem:[%s2174_s27 + $0x60] sm:$0xff] %v806_v29 }
 0x3be   : > { %v1268_v30 = vpop.f32.mrb[14].mxu1 }
 0x3bf   : > { %840 = vst [vmem:[%s2174_s27 + $0x78] sm:$0xff] %v1268_v30  ;;  %v816_v31 = vpop.f32.mrb[15].mxu1 }
 0x3c0   : > { %839 = vst [vmem:[%s2174_s27 + $0x70] sm:$0xff] %v816_v31 }
 0x3c1   : > { %1609 = shalt.err (!%p1606_p5)
}
 0x3c2   : > { %s1610_s19 = scalar_lea.hbm %s2196_s5, 2048  ;;  %s1614_s6 = scalar_lea.hbm %s2255_s3, 4096 }
 0x3c3   : > { %p1611_p7 = scmp.ne.s32.totalorder %s2196_s5, %s1610_s19  ;;  %p1615_p0 = scmp.lt.u32.totalorder %s2196_s5, %s2255_s3 }
 0x3c4   : > { %p1616_p8 = scmp.lt.u32.totalorder %s1614_s6, %s1610_s19  ;;  %p1618_p12 = scmp.lt.u32.totalorder %s1610_s19, %s2196_s5 }
 0x3c5   : > { %p1612_p4 = pnand %p1611_p7, %p2288_p10 }
 0x3c6   : > { %p1617_p9 = por %p1616_p8, %p1615_p0 }
 0x3c7   : > { %p1613_p3 = pneg %p1612_p4 }
 0x3c8   : > { %p1619_p1 = por %p1618_p12, %p1617_p9 }
 0x3ca   : > { %p1620_p6 = pnand %p1619_p1, %p1613_p3 }
 0x3cc   : > { %1623 = shalt.err (!%p1620_p6)
}
 0x3cd   : > { %1339 = dma.vmem_to_hbm [thread:$0]  (%p2288_p10), %s2198_s14, 2048, %s2196_s5, %s858_s7, %s1694_s13, %s1694_s13, %s1695_s21  }
 0x3ce PF: > { %s2289_s26 = sld [smem:[#allocation16_spill]]  ;;  %s911_s22 = sand.u32 1, %s1666_s15  }
 0x3cf   : > { %p2290_p13 = scmp.ne.s32.totalorder %s2276_s30, 0  ;;  %s912_s24 = scalar_lea.sflag [#allocation4], %s911_s22 }
 0x3d4   : > { %p2291_p11 = scmp.ge.s32.totalorder %s2289_s26, 2 }
 0x3d6   : > { %p1354_p2 = pnand %p2291_p11, %p2290_p13 }
 0x3d8   : > { %1657 = dma.done.wait (!%p1354_p2), %s912_s24, 2048  }
 0x3d9   : > { %1659 = vsyncadd (!%p1354_p2), %s912_s24, 4294965248  ;;  %s921_s28 = scalar_lea.sflag [#allocation10], %s911_s22 }
 0x3da   : > { %1661 = dma.done.wait (!%p1354_p2), %s921_s28, 2048  }
 0x3db   : > { %1663 = vsyncadd (!%p1354_p2), %s921_s28, 4294965248  ;;  %s27_s20 = sadd.s32 1, %s2289_s26   ;;  %s2292_s25 = sld [smem:[#allocation18_spill]] }
 0x3dc   : > { %p24_p5 = scmp.ge.s32.totalorder %s27_s20, 4   ;;  %s2293_s18 = sld [smem:[#allocation15_spill]] }
 0x3dd   : > { %s2294_s19 = sld [smem:[#allocation17_spill]]  ;;  %s2295_s15 = smov %s1670_s16 }
 0x3de   : > { %s2296_s16 = smov %s1674_s17  ;;  %26 = sbr.rel (!%p24_p5) target bundleno = 12 (0xc), region = 118 }
 0x3e1   : > { %s2297_s17 = smov %s2292_s25 }
 0x3e5   :  { %926 = vsyncpa [#allocation3], 1 }
 0x3e6   :  { %928 = vsyncpa [#allocation3 + $0x1], 1 }
 0x3e7   :  { %929 = vsyncpa [#allocation6], 1 }
 0x3e8   :  { %931 = vsyncpa [#allocation6 + $0x1], 1 }
 0x3e9   :  { %932 = vsyncpa [#allocation4], 1 }
 0x3ea   :  { %934 = vsyncpa [#allocation4 + $0x1], 1 }
 0x3eb   :  { %935 = vsyncpa [#allocation10], 1 }
 0x3ec   :  { %937 = vsyncpa [#allocation10 + $0x1], 1 }

</bundles_post_ra>
